<compile_context>
chip_gen: v7x
topology: tpu7x:2x2x1
jax: 0.10.0
libtpu: 0.0.40
codegen_flags: <defaults>
</compile_context>

<pallas_src>
import jax
import jax.numpy as jnp
from jax import lax
from jax.experimental import pallas as pl
from jax.experimental.pallas import tpu as pltpu


# ---------------------------------------------------------------------------
# Tiling / VMEM budgeting helpers
# ---------------------------------------------------------------------------

_VMEM_FLOOR = 32 << 20        # never request less scoped VMEM than this
_VMEM_CAP = 60 << 20          # stay under v7x's 64 MiB physical VMEM per core
_FUSED_SLAB_LIMIT = 12 << 20  # max per-image (C, HW) slab for the fused SE path


def _vmem_limit(*buffer_bytes):
    """Explicit scoped-VMEM request: live pipeline buffers + headroom."""
    need = sum(int(b) for b in buffer_bytes) + (4 << 20)
    return int(min(_VMEM_CAP, max(_VMEM_FLOOR, need)))


def _pick_hw_tile(hw, max_tile=2048):
    """Largest multiple-of-128 divisor of `hw` that is <= max_tile, else None."""
    t = min(max_tile, (hw // 128) * 128)
    while t >= 128:
        if hw % t == 0:
            return t
        t -= 128
    return None


def _hw_tile_or_full(hw, max_tile=2048):
    t = _pick_hw_tile(hw, max_tile)
    return hw if t is None else t


def _pick_batch_block(n, slab_bytes):
    """Images per grid step for the fused SE kernel: big enough to amortize the
    ~0.35us per-step overhead on small feature maps, but keep >= 2 grid steps
    (when n allows) so both v7x TensorCores get work, and cap the unroll."""
    target = 2 << 20
    cap = max(1, min(n, 8, target // max(slab_bytes, 1)))
    if n >= 2:
        cap = max(1, min(cap, n // 2))
    bn = cap
    while n % bn:
        bn -= 1
    return bn


# ---------------------------------------------------------------------------
# Kernel bodies
# ---------------------------------------------------------------------------


def _conv1x1_bn_hswish_kernel(x_ref, w_ref, b_ref, o_ref):
    """1x1 conv (+ folded BN) + hardswish for one (image, HW-tile) block.

    x_ref: (1, Cin, tHW) native dtype; w_ref: (Cout, Cin) native dtype;
    b_ref: (Cout, 1) f32 folded-BN shift; o_ref: (1, Cout, tHW).
    """
    y = jnp.dot(w_ref[...], x_ref[0], preferred_element_type=jnp.float32)
    y = y + b_ref[...]
    y = y * jnp.clip((y + 3.0) * (1.0 / 6.0), 0.0, 1.0)        # hardswish
    o_ref[0] = y.astype(o_ref.dtype)


def _ese_fused_kernel(x_ref, w_ref, b_ref, o_ref):
    """Fused EffectiveSELayer for a (bN, C, HW) block:
    squeeze -> excite -> hardsigmoid -> scale in one pass over the slab.

    x_ref/o_ref: (bN, C, HW) native dtype; w_ref: (C, C) f32; b_ref: (C, 1) f32.
    """
    bn, _, hw = x_ref.shape
    inv_hw = jnp.float32(1.0 / hw)
    # Spatial reduce as an MXU matmul against a ones column: keeps the slab in
    # its native dtype (no extra f32 copy) and keeps the reduce off the XLU.
    ones_col = jnp.ones((hw, 1), dtype=x_ref.dtype)
    for i in range(bn):                                        # static unroll, bn <= 8
        x = x_ref[i]                                           # (C, HW)
        mean = jnp.dot(x, ones_col, preferred_element_type=jnp.float32) * inv_hw
        se = jnp.dot(w_ref[...], mean, preferred_element_type=jnp.float32)
        se = se + b_ref[...]                                   # (C, 1), no transpose
        gate = jnp.clip((se + 3.0) * (1.0 / 6.0), 0.0, 1.0)    # hardsigmoid
        o_ref[i] = x * gate.astype(x_ref.dtype)                # native-dtype multiply


def _ese_sum_kernel(x_ref, s_ref):
    """Tiled-path phase 1: accumulate per-channel sums over HW tiles (f32)."""
    @pl.when(pl.program_id(1) == 0)
    def _():
        s_ref[...] = jnp.zeros_like(s_ref)

    ones_col = jnp.ones((x_ref.shape[2], 1), dtype=x_ref.dtype)
    s_ref[0] += jnp.dot(x_ref[0], ones_col, preferred_element_type=jnp.float32)


def _ese_scale_kernel(x_ref, g_ref, o_ref):
    """Tiled-path phase 2: lane-dense broadcast multiply by the (C, 1) gate."""
    o_ref[0] = x_ref[0] * g_ref[0]


# ---------------------------------------------------------------------------
# ConvBNLayer wrappers
# ---------------------------------------------------------------------------


def conv1x1_bn_hardswish(x_nchw, w, gamma, beta, mean, var, eps=1e-5):
    """ConvBNLayer(filter_size=1): 1x1 conv (no bias) + BN (eval) + hardswish."""
    n, cin, h, wd = x_nchw.shape
    cout = w.shape[0]
    hw = h * wd
    x3 = x_nchw.reshape(n, cin, hw)

    scale = (gamma / jnp.sqrt(var + eps)).astype(jnp.float32)
    w_eff = (w.astype(jnp.float32) * scale[:, None]).astype(x_nchw.dtype)  # (Cout, Cin)
    b_eff = (beta.astype(jnp.float32) - mean.astype(jnp.float32) * scale)
    b_eff = b_eff.reshape(cout, 1)                                          # (Cout, 1)

    itemsize = jnp.dtype(x_nchw.dtype).itemsize
    t = _hw_tile_or_full(hw)
    vmem = _vmem_limit(2 * cin * t * itemsize, 2 * cout * t * itemsize,
                       2 * (w_eff.size * itemsize + cout * 4))

    out = pl.pallas_call(
        _conv1x1_bn_hswish_kernel,
        out_shape=jax.ShapeDtypeStruct((n, cout, hw), x_nchw.dtype),
        grid=(n, hw // t),
        in_specs=[
            pl.BlockSpec((1, cin, t), lambda i, j: (i, 0, j)),
            pl.BlockSpec((cout, cin), lambda i, j: (0, 0)),
            pl.BlockSpec((cout, 1), lambda i, j: (0, 0)),
        ],
        out_specs=pl.BlockSpec((1, cout, t), lambda i, j: (i, 0, j)),
        compiler_params=pltpu.CompilerParams(
            dimension_semantics=("parallel", "parallel"),
            vmem_limit_bytes=vmem),
    )(x3, w_eff, b_eff)
    return out.reshape(n, cout, h, wd)


def conv3x3_s2_bn_hardswish(x_nchw, w, gamma, beta, mean, var, eps=1e-5):
    """ConvBNLayer(filter_size=3, stride=2, padding=1): the conv_down branch."""
    # TODO(synk): the 3x3 stride-2 spatial conv is left to XLA (lax.conv); only the
    # 1x1 convs and the SE attention are Pallas-ized in this file.
    scale = gamma / jnp.sqrt(var + eps)
    y = lax.conv_general_dilated(
        x_nchw, w, window_strides=(2, 2), padding=((1, 1), (1, 1)),
        dimension_numbers=('NCHW', 'OIHW', 'NCHW'))
    y = y * scale[None, :, None, None] + (beta - mean * scale)[None, :, None, None]
    return y * jnp.clip((y + 3.0) * (1.0 / 6.0), 0.0, 1.0)


# ---------------------------------------------------------------------------
# EffectiveSELayer wrapper (fused path + tiled two-phase fallback)
# ---------------------------------------------------------------------------


def effective_se_layer(x_nchw, w, b, *, force_tiled=False):
    """x * hardsigmoid(conv1x1(mean_{H,W}(x))).  w: (C, C), b: (C,)."""
    n, c, h, wd = x_nchw.shape
    hw = h * wd
    x3 = x_nchw.reshape(n, c, hw)
    itemsize = jnp.dtype(x_nchw.dtype).itemsize
    slab = c * hw * itemsize
    w32 = w.astype(jnp.float32)
    b32 = b.astype(jnp.float32)

    if (not force_tiled) and slab <= _FUSED_SLAB_LIMIT:
        out = _ese_fused(x3, w32, b32)
    else:
        out = _ese_tiled(x3, w32, b32)
    return out.reshape(n, c, h, wd)


def _ese_fused(x3, w32, b32):
    n, c, hw = x3.shape
    itemsize = jnp.dtype(x3.dtype).itemsize
    slab = c * hw * itemsize
    bn = _pick_batch_block(n, slab)
    vmem = _vmem_limit(4 * bn * slab, 2 * (c * c + c * 128) * 4)

    return pl.pallas_call(
        _ese_fused_kernel,
        out_shape=jax.ShapeDtypeStruct((n, c, hw), x3.dtype),
        grid=(n // bn,),
        in_specs=[
            pl.BlockSpec((bn, c, hw), lambda i: (i, 0, 0)),
            pl.BlockSpec((c, c), lambda i: (0, 0)),
            pl.BlockSpec((c, 1), lambda i: (0, 0)),
        ],
        out_specs=pl.BlockSpec((bn, c, hw), lambda i: (i, 0, 0)),
        compiler_params=pltpu.CompilerParams(
            dimension_semantics=("parallel",),
            vmem_limit_bytes=vmem),
    )(x3, w32, b32.reshape(c, 1))


def _ese_tiled(x3, w32, b32):
    """Two-phase path for slabs too big to double-buffer in VMEM (e.g. v7x):
    (1) per-image channel sums (Pallas reduce over HW tiles), (2) one batched
    excite matmul for all images in the wrapper, (3) lane-dense broadcast
    multiply kernel.  Costs one extra HBM read of x vs. the fused path."""
    n, c, hw = x3.shape
    itemsize = jnp.dtype(x3.dtype).itemsize

    # ---- phase 1: per-image channel sums --------------------------------
    t1 = _pick_hw_tile(hw, max_tile=4096)
    if t1 is None:
        # Rare (HW has no multiple-of-128 divisor): let XLA do the reduce.
        sums = jnp.sum(x3.astype(jnp.float32), axis=2, keepdims=True)
    else:
        vmem1 = _vmem_limit(2 * c * t1 * itemsize, 2 * c * 128 * 4)
        sums = pl.pallas_call(
            _ese_sum_kernel,
            out_shape=jax.ShapeDtypeStruct((n, c, 1), jnp.float32),
            grid=(n, hw // t1),
            in_specs=[pl.BlockSpec((1, c, t1), lambda i, j: (i, 0, j))],
            out_specs=pl.BlockSpec((1, c, 1), lambda i, j: (i, 0, 0)),
            compiler_params=pltpu.CompilerParams(
                dimension_semantics=("parallel", "arbitrary"),
                vmem_limit_bytes=vmem1),
        )(x3)

    # ---- excite: one batched (N, C) @ (C, C) matmul for all images ------
    means = sums[:, :, 0] * (1.0 / hw)                                    # (N, C)
    se = jnp.einsum('nc,oc->no', means, w32,
                    precision=lax.Precision.HIGHEST) + b32[None, :]
    gates = jnp.clip((se + 3.0) * (1.0 / 6.0), 0.0, 1.0)                  # (N, C)
    # Native-dtype gate so the multiply kernel never materializes f32 slabs.
    gates = gates.astype(x3.dtype).reshape(n, c, 1)

    # ---- phase 2: broadcast multiply, grid parallel over (N, HW tiles) ---
    t2 = _hw_tile_or_full(hw, max_tile=2048)
    vmem2 = _vmem_limit(4 * c * t2 * itemsize, 2 * c * 128 * itemsize)
    return pl.pallas_call(
        _ese_scale_kernel,
        out_shape=jax.ShapeDtypeStruct((n, c, hw), x3.dtype),
        grid=(n, hw // t2),
        in_specs=[
            pl.BlockSpec((1, c, t2), lambda i, j: (i, 0, j)),
            pl.BlockSpec((1, c, 1), lambda i, j: (i, 0, 0)),
        ],
        out_specs=pl.BlockSpec((1, c, t2), lambda i, j: (i, 0, j)),
        compiler_params=pltpu.CompilerParams(
            dimension_semantics=("parallel", "parallel"),
            vmem_limit_bytes=vmem2),
    )(x3, gates)


# ---------------------------------------------------------------------------
# CSPResStage forward
# ---------------------------------------------------------------------------


def csp_res_stage_forward(x, params):
    """Forward pass of CSPResStage (eval-mode BN), mirroring the PyTorch module."""
    if params.get('conv_down') is not None:
        cd = params['conv_down']
        x = conv3x3_s2_bn_hardswish(x, cd['w'], cd['gamma'], cd['beta'],
                                    cd['mean'], cd['var'])
    c1, c2, c3 = params['conv1'], params['conv2'], params['conv3']
    y1 = conv1x1_bn_hardswish(x, c1['w'], c1['gamma'], c1['beta'], c1['mean'], c1['var'])
    y2 = conv1x1_bn_hardswish(x, c2['w'], c2['gamma'], c2['beta'], c2['mean'], c2['var'])
    # TODO(synk): `block_fn` residual blocks are a constructor-injected dependency not
    # defined in the spec; with n=0 the blocks nn.Sequential() is the identity (modeled here).
    y = jnp.concatenate([y1, y2], axis=1)
    if params.get('attn') is not None:
        y = effective_se_layer(y, params['attn']['w'], params['attn']['b'])
    return conv1x1_bn_hardswish(y, c3['w'], c3['gamma'], c3['beta'], c3['mean'], c3['var'])


# ---------------------------------------------------------------------------
# Pure-JAX references (mirror the PyTorch forward, eval-mode BN)
# ---------------------------------------------------------------------------


def _ref_conv1x1_bn_hardswish(x, c, eps=1e-5):
    scale = c['gamma'] / jnp.sqrt(c['var'] + eps)
    y = jnp.einsum('oc,nchw->nohw', c['w'], x, precision=lax.Precision.HIGHEST)
    y = y * scale[None, :, None, None] + (c['beta'] - c['mean'] * scale)[None, :, None, None]
    return y * jnp.clip((y + 3.0) / 6.0, 0.0, 1.0)


def _ref_ese(x, w, b):
    s = jnp.mean(x, axis=(2, 3), keepdims=True)
    s = jnp.einsum('oc,ncij->noij', w, s,
                   precision=lax.Precision.HIGHEST) + b[None, :, None, None]
    return x * jnp.clip((s + 3.0) / 6.0, 0.0, 1.0)


def _ref_csp_res_stage(x, params):
    y1 = _ref_conv1x1_bn_hardswish(x, params['conv1'])
    y2 = _ref_conv1x1_bn_hardswish(x, params['conv2'])
    y = jnp.concatenate([y1, y2], axis=1)
    y = _ref_ese(y, params['attn']['w'], params['attn']['b'])
    return _ref_conv1x1_bn_hardswish(y, params['conv3'])


# ---------------------------------------------------------------------------
# Example / self-check
# ---------------------------------------------------------------------------


def _make_convbn_params(key, cin, cout):
    k1, k2, k3, k4, k5 = jax.random.split(key, 5)
    return {
        'w': jax.random.normal(k1, (cout, cin), dtype=jnp.float32) * (1.0 / cin) ** 0.5,
        'gamma': 1.0 + 0.1 * jax.random.normal(k2, (cout,), dtype=jnp.float32),
        'beta': 0.1 * jax.random.normal(k3, (cout,), dtype=jnp.float32),
        'mean': 0.1 * jax.random.normal(k4, (cout,), dtype=jnp.float32),
        'var': 1.0 + 0.2 * jax.random.uniform(k5, (cout,), dtype=jnp.float32),
    }


if __name__ == "__main__":
    key = jax.random.PRNGKey(0)
    k_x, k_c1, k_c2, k_c3, k_aw, k_ab, k_x2 = jax.random.split(key, 7)

    # CSPResStage(block_fn, ch_in=8, ch_out=8, n=0, stride=1, attn='eca')
    N, ch_in, ch_out, H, W = 2, 8, 8, 16, 16
    ch_mid = (ch_in + ch_out) // 2                       # 8
    x = jax.random.normal(k_x, (N, ch_in, H, W), dtype=jnp.float32)

    params = {
        'conv_down': None,                               # stride == 1
        'conv1': _make_convbn_params(k_c1, ch_mid, ch_mid // 2),
        'conv2': _make_convbn_params(k_c2, ch_mid, ch_mid // 2),
        'conv3': _make_convbn_params(k_c3, ch_mid, ch_out),
        'attn': {
            'w': 0.2 * jax.random.normal(k_aw, (ch_mid, ch_mid), dtype=jnp.float32),
            'b': 0.1 * jax.random.normal(k_ab, (ch_mid,), dtype=jnp.float32),
        },
    }

    out = csp_res_stage_forward(x, params)
    jax.block_until_ready(out)
    ref = _ref_csp_res_stage(x, params)
    assert out.shape == ref.shape == (N, ch_out, H, W)
    assert jnp.allclose(out, ref, atol=1e-3, rtol=1e-3), (
        "CSPResStage mismatch, max abs err="
        + str(float(jnp.max(jnp.abs(out - ref)))))

    # Also exercise the tiled two-phase SE fallback (used when the per-image
    # (C, HW) slab is too large to double-buffer in VMEM, e.g. on v7x).
    x_se = jax.random.normal(k_x2, (N, ch_mid, H, W), dtype=jnp.float32)
    ese_fused = effective_se_layer(x_se, params['attn']['w'], params['attn']['b'])
    ese_tiled = effective_se_layer(x_se, params['attn']['w'], params['attn']['b'],
                                   force_tiled=True)
    jax.block_until_ready((ese_fused, ese_tiled))
    ese_ref = _ref_ese(x_se, params['attn']['w'], params['attn']['b'])
    assert jnp.allclose(ese_fused, ese_ref, atol=1e-4, rtol=1e-4)
    assert jnp.allclose(ese_tiled, ese_ref, atol=1e-4, rtol=1e-4)

    print("KERNEL_OK")
</pallas_src>

<mosaic_0001>
module attributes {stable_mosaic.version = 11 : i64} {
  func.func @_conv1x1_bn_hswish_kernel(%arg0: i32, %arg1: i32, %arg2: memref<1x8x256xf32, #tpu.memory_space<vmem>>, %arg3: memref<4x8xf32, #tpu.memory_space<vmem>>, %arg4: memref<4x1xf32, #tpu.memory_space<vmem>>, %arg5: memref<1x4x256xf32, #tpu.memory_space<vmem>>) attributes {dimension_semantics = [#tpu.dimension_semantics<parallel>, #tpu.dimension_semantics<parallel>], iteration_bounds = array<i64: 2, 1>, scalar_prefetch = 0 : i64, scratch_operands = 0 : i64, tpu.core_type = #tpu.core_type<tc>, window_params = [{transform_indices = @transform_0, window_bounds = array<i64: 1, 8, 256>}, {pipeline_mode = #tpu.pipeline_mode<synchronous>, transform_indices = @transform_1, window_bounds = array<i64: 4, 8>}, {pipeline_mode = #tpu.pipeline_mode<synchronous>, transform_indices = @transform_2, window_bounds = array<i64: 4, 1>}, {transform_indices = @transform_3, window_bounds = array<i64: 1, 4, 256>}]} {
    %c0 = arith.constant 0 : index
    %c0_0 = arith.constant 0 : index
    %0 = vector.load %arg3[%c0, %c0_0] : memref<4x8xf32, #tpu.memory_space<vmem>>, vector<4x8xf32>
    %c0_1 = arith.constant 0 : index
    %c0_2 = arith.constant 0 : index
    %c0_3 = arith.constant 0 : index
    %1 = vector.load %arg2[%c0_1, %c0_2, %c0_3] : memref<1x8x256xf32, #tpu.memory_space<vmem>>, vector<1x8x256xf32>
    %2 = vector.shape_cast %1 : vector<1x8x256xf32> to vector<8x256xf32>
    %cst = arith.constant dense<0.000000e+00> : vector<4x256xf32>
    %3 = tpu.matmul %0, %2, %cst {dimension_numbers = #tpu.dot_dimension_numbers<[1], [0], [0], [1], [0, 0, 1, 1], [], []>} : vector<4x8xf32>, vector<8x256xf32>, vector<4x256xf32> -> vector<4x256xf32>
    %c0_4 = arith.constant 0 : index
    %c0_5 = arith.constant 0 : index
    %4 = vector.load %arg4[%c0_4, %c0_5] : memref<4x1xf32, #tpu.memory_space<vmem>>, vector<4x1xf32>
    %5 = vector.broadcast %4 : vector<4x1xf32> to vector<4x256xf32>
    %6 = arith.addf %3, %5 : vector<4x256xf32>
    %cst_6 = arith.constant 3.000000e+00 : f32
    %7 = vector.broadcast %cst_6 : f32 to vector<4x256xf32>
    %8 = arith.addf %6, %7 : vector<4x256xf32>
    %cst_7 = arith.constant 0.166666672 : f32
    %9 = vector.broadcast %cst_7 : f32 to vector<4x256xf32>
    %10 = arith.mulf %8, %9 : vector<4x256xf32>
    %cst_8 = arith.constant 0.000000e+00 : f32
    %cst_9 = arith.constant 1.000000e+00 : f32
    %11 = vector.broadcast %cst_8 : f32 to vector<4x256xf32>
    %12 = arith.maximumf %11, %10 : vector<4x256xf32>
    %13 = vector.broadcast %cst_9 : f32 to vector<4x256xf32>
    %14 = arith.minimumf %13, %12 : vector<4x256xf32>
    %15 = arith.mulf %6, %14 : vector<4x256xf32>
    %c0_10 = arith.constant 0 : index
    %c0_11 = arith.constant 0 : index
    %c0_12 = arith.constant 0 : index
    %16 = vector.load %arg5[%c0_10, %c0_11, %c0_12] : memref<1x4x256xf32, #tpu.memory_space<vmem>>, vector<1x4x256xf32>
    %17 = vector.shape_cast %16 : vector<1x4x256xf32> to vector<4x256xf32>
    %18 = vector.shape_cast %15 : vector<4x256xf32> to vector<1x4x256xf32>
    tpu.vector_store %arg5[%c0_10, %c0_11, %c0_12], %18 {strides = array<i32>} : memref<1x4x256xf32, #tpu.memory_space<vmem>>, vector<1x4x256xf32>,
    return
  }
  func.func @transform_0(%arg0: i32, %arg1: i32) -> (i32, i32, i32) {
    %c0_i32 = arith.constant 0 : i32
    %c0_i32_0 = arith.constant 0 : i32
    return %arg0, %c0_i32, %arg1 : i32, i32, i32
  }
  func.func @transform_1(%arg0: i32, %arg1: i32) -> (i32, i32) {
    %c0_i32 = arith.constant 0 : i32
    %c0_i32_0 = arith.constant 0 : i32
    %c0_i32_1 = arith.constant 0 : i32
    return %c0_i32, %c0_i32_0 : i32, i32
  }
  func.func @transform_2(%arg0: i32, %arg1: i32) -> (i32, i32) {
    %c0_i32 = arith.constant 0 : i32
    %c0_i32_0 = arith.constant 0 : i32
    %c0_i32_1 = arith.constant 0 : i32
    return %c0_i32, %c0_i32_0 : i32, i32
  }
  func.func @transform_3(%arg0: i32, %arg1: i32) -> (i32, i32, i32) {
    %c0_i32 = arith.constant 0 : i32
    %c0_i32_0 = arith.constant 0 : i32
    return %arg0, %c0_i32, %arg1 : i32, i32, i32
  }
}

</mosaic_0001>

<bundles_post_ra>
// kernel: tpu_custom_call.1
= control target key start
LH: loop header
LB: loop body
LE: loop exit
PB: predicated region body
PF: predicated region fallthrough
CT: control target
= control target key end

     0   :  { %8 = vsyncpa [#allocation3], 0  ;;  %s807_s0 = inlined_call_operand.hbm [shape: f32[2,8,256], index: 0, kind: input, shape index: {}]   ;;  %s808_s1 = inlined_call_operand.vmem [shape: f32[4,8], index: 1, kind: input, shape index: {}]   ;;  %s809_s2 = inlined_call_operand.vmem [shape: f32[4,1], index: 2, kind: input, shape index: {}]   ;;  %s810_s3 = inlined_call_operand.hbm [shape: f32[2,4,256], index: 3, kind: output, shape index: {}]  }
   0x1   :  { %10 = vsyncpa [#allocation3 + $0x1], 0 }
   0x2   :  { %11 = vsyncpa [#allocation4], 0 }
   0x3   :  { %13 = vsyncpa [#allocation4 + $0x1], 0  ;;  %s628_s12 = smov 0   ;;  %s630_s13 = smov 0  }
   0x4   :  { %s632_s14 = smov 0   ;;  %s634_s15 = smov 0  }
   0x5   :  { %s636_s16 = smov 0   ;;  %s638_s17 = smov 0  }
   0x6 LB: > { %s407_s18 = sadd.s32 4294967295, %s602_s17   ;;  %s408_s19 = sadd.s32 4294967294, %s602_s17   ;;  %s602_s17 = sphi %s638_s17, %s19_s17   ;;  %s598_s16 = sphi %s636_s16, %s826_s16   ;;  %s594_s15 = sphi %s634_s15, %s825_s15   ;;  %s590_s14 = sphi %s632_s14, %s824_s14   ;;  %s586_s13 = sphi %s630_s13, %s823_s13   ;;  %s582_s12 = sphi %s628_s12, %s822_s12  }
   0x7   : > { %s31_s20 = sadd.s32 1, %s598_s16  ;;  %s40_s21 = sadd.s32 1, %s590_s14 }
   0x8   : > { %p33_p0 = scmp.ge.s32.totalorder %s31_s20, 2  ;;  %p47_p1 = scmp.ne.s32.totalorder %s590_s14, %s586_s13 }
   0x9   : > { %p48_p2 = scmp.eq.s32.totalorder %s602_s17, 0  ;;  %p53_p3 = scmp.ne.s32.totalorder %s586_s13, %s582_s12 }
   0xa   : > { %s828_s20 = smov (%p33_p0, %s31_s20), 0  ;;  %p54_p5 = scmp.eq.s32.totalorder %s407_s18, 0 }
   0xb   : > { %p669_p4 = por %p48_p2, %p47_p1  ;;  %s35_s23 = ssub.s32 %s598_s16, %s828_s20 }
   0xc   : > { %p121_p6 = scmp.eq.s32.totalorder %s407_s18, 1  ;;  %p38_p7 = scmp.eq.s32.totalorder %s35_s23, 0 }
   0xd   : > { %p675_p8 = por %p54_p5, %p53_p3  ;;  %p127_p10 = scmp.eq.s32.totalorder %s408_s19, 1 }
   0xe   : > { %p679_p9 = por %p121_p6, %p47_p1  ;;  %p437_p13 = scmp.lt.s32.totalorder %s602_s17, 2 }
   0xf   : > { %s684_s26 = scalar_select %p38_p7, %s590_s14, %s40_s21  }
  0x10   : > { %s814_s25 = scalar_select %p679_p9, 1, 0 }
  0x11   : > { %p686_p11 = por %p127_p10, %p53_p3  ;;  %s153_s28 = sand.u32 1, %s590_s14  }
  0x12   : > { %s411_s29 = sshll.u32 %s153_s28, 4  ;;  %s423_s30 = sshll.u32 %s598_s16, 8 }
  0x13   : > { %s815_s27 = scalar_select %p686_p11, 1, 0 }
  0x14   : > { %s697_s6 = scalar_lea.hbm %s807_s0, %s423_s30  ;;  %s157_s7 = scalar_lea.vmem [#allocation2], %s411_s29 }
  0x15   : > { %s167_s8 = sshll.u32 %s157_s7, 4  ;;  %p703_p0 = pnand %p437_p13, %p669_p4  ;;  %s699_s8 = int_to_ptr.vmem [resolvable:$true] %s167_s8 }
  0x16   : > { %s154_s10 = scalar_lea.sflag [#allocation3], %s153_s28  ;;  %s490_s11 = scalar_lea.hbm %s697_s6, 256 }
  0x17   : > { %p491_p3 = scmp.ne.s32.totalorder %s697_s6, %s490_s11  ;;  %p492_p5 = pneg %p703_p0 }
  0x18   : > { %s495_s21 = scalar_lea.hbm %s807_s0, 512  ;;  %p496_p4 = scmp.lt.u32.totalorder %s697_s6, %s807_s0 }
  0x19   : > { %p493_p6 = pnand %p492_p5, %p491_p3  ;;  %p497_p10 = scmp.lt.u32.totalorder %s495_s21, %s490_s11 }
  0x1a   : > { %p499_p12 = scmp.lt.u32.totalorder %s490_s11, %s697_s6 }
  0x1b   : > { %p494_p7 = pneg %p493_p6  ;;  %p498_p13 = por %p497_p10, %p496_p4 }
  0x1d   : > { %p500_p1 = por %p499_p12, %p498_p13 }
  0x1f   : > { %p501_p2 = pnand %p500_p1, %p494_p7 }
  0x21   : > { %504 = shalt.err (!%p501_p2)
}
  0x22   : > { %s505_s28 = scalar_lea.vmem %s699_s8, 256  ;;  %s604_s29 = smov [#allocation2]  }
  0x23   : > { %p506_p3 = scmp.ne.s32.totalorder %s699_s8, %s505_s28  ;;  %s510_s30 = sshll.u32 %s604_s29, 4  ;;  %s511_s30 = int_to_ptr.vmem [resolvable:$false] %s510_s30 }
  0x24   : > { %s512_s4 = scalar_lea.vmem %s511_s30, 512  ;;  %p513_p9 = scmp.lt.s32.totalorder %s699_s8, %s511_s30 }
  0x25   : > { %p508_p6 = pnand %p506_p3, %p492_p5  ;;  %p514_p4 = scmp.lt.s32.totalorder %s512_s4, %s505_s28 }
  0x27   : > { %p509_p11 = pneg %p508_p6  ;;  %p515_p10 = por %p514_p4, %p513_p9 }
  0x29   : > { %p516_p12 = pnand %p515_p10, %p509_p11 }
  0x2b   : > { %519 = shalt.err (!%p516_p12)
}
  0x2c   : > { %432 = dma.hbm_to_vmem [thread:$0]  (!%p703_p0), %s697_s6, 256, %s699_s8, %s154_s10  }
  0x2d   : > { %p817_p1 = scmp.lt.s32.totalorder %s602_s17, 3  ;;  %p818_p2 = scmp.ge.s32.totalorder %s602_s17, 1 }
  0x2f   : > { %p173_p5 = pnand %p818_p2, %p817_p1 }
  0x30   : > { %s739_s5 = sand.u32 (!%p173_p5), 1, %s586_s13  }
  0x31   : > { %176 = sbr.rel (%p173_p5) target bundleno = 302 (0x12e), region = 32  ;;  %s415_s7 = sshll.u32 (!%p173_p5), %s739_s5, 4 }
  0x32   : > { %s179_s11 = scalar_lea.sflag (!%p173_p5), [#allocation3], %s739_s5  ;;  %s182_s18 = scalar_lea.vmem (!%p173_p5), [#allocation2], %s415_s7 }
  0x38   : > { %573 = dma.done.wait (%p675_p8), %s179_s11, 256  }
  0x39   : > { %575 = vsyncadd (%p675_p8), %s179_s11, 4294967040  ;;  %v605_v0 = vmov 0.0   ;;  %v606_v1 = vmov 0   ;;  %v209_v2 = vld [vmem:[%s182_s18 + $0x8] sm:$0xff]  ;;  %v208_v3 = vld [vmem:[%s182_s18] sm:$0xff]  ;;  %vm216_vm0 = vcmask 64512  }
  0x3a   : > { %284 = vmatprep.mubr.f32.mxu0 %v605_v0  ;;  %489 = vset.pattern.permute.xlu0 %v606_v1  ;;  %v207_v4 = vld [vmem:[%s808_s1] sm:$0xf]  ;;  %s416_s24 = sshll.u32 %s739_s5, 3  ;;  %s424_s19 = sshll.u32 %s594_s15, 7 }
  0x3b   : > { %220 = vmatprep.subr.mxu0 %v209_v2  ;;  %v210_v5 = vld [vmem:[%s809_s2] sm:$0xf]  ;;  %s204_s21 = scalar_lea.vmem [#allocation5], %s416_s24  ;;  %s758_s29 = scalar_lea.hbm %s810_s3, %s424_s19 }
  0x3c   : > { %221 = vmatpush1.msra.mxu0 %v208_v3  ;;  %213 = vperm.xlu0 %489, %v210_v5   ;;  %s323_s22 = sshll.u32 %s204_s21, 4  ;;  %s307_s30 = scalar_lea.sflag [#allocation4], %s739_s5  ;;  %s760_s22 = int_to_ptr.vmem [resolvable:$true] %s323_s22 }
  0x3d   : > { %417 = vmatmul.mubr.msk.f32.vlgmr.msra.gmra.mrb[0].mxu0 %vm216_vm0, %v207_v4  ;;  %s520_s4 = scalar_lea.vmem %s760_s22, 128  ;;  %p819_p9 = scmp.ne.s32.totalorder %s814_s25, 0 }
  0x3e   : > { %p521_p8 = scmp.ne.s32.totalorder %s760_s22, %s520_s4  ;;  %s607_s15 = smov [#allocation5]  }
  0x3f   : > { %s524_s7 = sshll.u32 %s607_s15, 4  ;;  %s525_s7 = int_to_ptr.vmem [resolvable:$false] %s524_s7 }
  0x40   : > { %p522_p11 = pnand %p521_p8, %p819_p9  ;;  %s526_s11 = scalar_lea.vmem %s525_s7, 256 }
  0x41   : > { %p527_p7 = scmp.lt.s32.totalorder %s760_s22, %s525_s7  ;;  %p528_p13 = scmp.lt.s32.totalorder %s526_s11, %s520_s4 }
  0x42   : > { %p523_p0 = pneg %p522_p11 }
  0x43   : > { %p529_p3 = por %p528_p13, %p527_p7 }
  0x45   : > { %p530_p6 = pnand %p529_p3, %p523_p0 }
  0xbb   : > { %v214_v6 = vpop.permute.xlu0 %213 }
 0x110   : > { %v286_v7 = vpop.f32.mrb[0].mxu0 }
 0x111   : > { %v287_v8 = vadd.f32 %v286_v7, %v214_v6  ;;  %v288_v9 = vpop.f32.mrb[1].mxu0 }
 0x112   : > { %v289_v10 = vadd.f32 %v288_v9, %v214_v6 }
 0x113   : > { %v291_v11 = vadd.f32 3.0, %v287_v8 }
 0x114   : > { %v292_v12 = vadd.f32 3.0, %v289_v10 }
 0x115   : > { %v293_v13 = vmul.f32 0.16666667, %v291_v11 }
 0x116   : > { %v294_v14 = vmul.f32 0.16666667, %v292_v12 }
 0x117   : > { %v295_v15 = vmax.f32 %v293_v13, 0.0 }
 0x118   : > { %v296_v16 = vmax.f32 %v294_v14, 0.0 }
 0x119   : > { %v297_v17 = vmin.f32 %v295_v15, 1.0 }
 0x11a   : > { %v298_v18 = vmin.f32 %v296_v16, 1.0 }
 0x11b   : > { %v299_v19 = vmul.f32 %v297_v17, %v287_v8 }
 0x11c   : > { %v300_v20 = vmul.f32 %v298_v18, %v289_v10 }
 0x11e   : > { %v303_v21 = vcombine.low %v299_v19, %v300_v20 }
 0x120   : > { %305 = vst [vmem:[%s204_s21] sm:$0xff] %v303_v21 }
 0x121   : > { %533 = shalt.err (!%p530_p6)
}
 0x122   : > { %s534_s5 = scalar_lea.hbm %s758_s29, 128  ;;  %s538_s8 = scalar_lea.hbm %s810_s3, 256 }
 0x123   : > { %p535_p4 = scmp.ne.s32.totalorder %s758_s29, %s534_s5  ;;  %p539_p1 = scmp.lt.u32.totalorder %s758_s29, %s810_s3 }
 0x124   : > { %p540_p2 = scmp.lt.u32.totalorder %s538_s8, %s534_s5  ;;  %p542_p8 = scmp.lt.u32.totalorder %s534_s5, %s758_s29 }
 0x125   : > { %p536_p10 = pnand %p535_p4, %p819_p9 }
 0x126   : > { %p541_p5 = por %p540_p2, %p539_p1 }
 0x127   : > { %p537_p12 = pneg %p536_p10 }
 0x128   : > { %p543_p11 = por %p542_p8, %p541_p5 }
 0x12a   : > { %p544_p0 = pnand %p543_p11, %p537_p12 }
 0x12c   : > { %547 = shalt.err (!%p544_p0)
}
 0x12d   : > { %427 = dma.vmem_to_hbm [thread:$0]  (%p819_p9), %s760_s22, 128, %s758_s29, %s307_s30  }
 0x12e PF: > { %s335_s24 = sand.u32 1, %s582_s12   ;;  %p820_p7 = scmp.ne.s32.totalorder %s815_s27, 0 }
 0x12f   : > { %p821_p13 = scmp.ge.s32.totalorder %s602_s17, 2  ;;  %s336_s19 = scalar_lea.sflag [#allocation4], %s335_s24 }
 0x131   : > { %p434_p3 = pnand %p821_p13, %p820_p7 }
 0x133   : > { %577 = dma.done.wait (!%p434_p3), %s336_s19, 128  }
 0x134   : > { %579 = vsyncadd (!%p434_p3), %s336_s19, 4294967168  ;;  %s19_s17 = sadd.s32 1, %s602_s17   ;;  %s822_s12 = smov %s586_s13 }
 0x135   : > { %p16_p6 = scmp.ge.s32.totalorder %s19_s17, 4   ;;  %s823_s13 = smov %s590_s14 }
 0x136   : > { %s824_s14 = smov %s684_s26  ;;  %s825_s15 = smov %s598_s16 }
 0x137   : > { %s826_s16 = smov %s828_s20  ;;  %18 = sbr.rel (!%p16_p6) target bundleno = 6 (0x6), region = 77 }
 0x13e   :  { %341 = vsyncpa [#allocation3], 1 }
 0x13f   :  { %343 = vsyncpa [#allocation3 + $0x1], 1 }
 0x140   :  { %344 = vsyncpa [#allocation4], 1 }
 0x141   :  { %346 = vsyncpa [#allocation4 + $0x1], 1 }

</bundles_post_ra>
